<compile_context>
chip_gen: v7x
topology: tpu7x:2x2x1
jax: 0.10.0
libtpu: 0.0.40
codegen_flags: <defaults>
</compile_context>

<pallas_src>
import functools

import jax
import jax.numpy as jnp
import numpy as np
from jax.experimental import pallas as pl
from jax.experimental.pallas import tpu as pltpu


def _silu(x):
    return x * jax.nn.sigmoid(x)


def _vmem_limit_bytes():
    # Generation-aware scoped-VMEM limit (~70% of physical); safe fallback.
    try:
        return int(pltpu.get_tpu_info().vmem_capacity_bytes * 0.7)
    except Exception:
        return 40 * 1024 * 1024


def _compiler_params(semantics):
    return pltpu.CompilerParams(dimension_semantics=semantics,
                                vmem_limit_bytes=_vmem_limit_bytes())


# --------------------------------------------------------------------------
# Kernel 1: fused cv1 + cv2  (single matmul vs concatenated weights) + BN + SiLU
#           Reads the NCHW input directly (relayout folded into the matmul).
# --------------------------------------------------------------------------
def _dual_pw_kernel(x_ref, w_ref, b_ref, y1_ref, y2_ref, *, c1_out):
    # x_ref: (C_in, thw) block of the NCHW input.
    x = x_ref[...].astype(jnp.bfloat16)
    # Transposed-LHS matmul: contract C_in (dim 0 of both) -> (thw, C1o+C2o).
    acc = jax.lax.dot_general(x, w_ref[...], (((0,), (0,)), ((), ())),
                              preferred_element_type=jnp.float32)
    a = _silu(acc + b_ref[...])
    y1_ref[...] = a[:, :c1_out].astype(y1_ref.dtype)
    y2_ref[...] = a[:, c1_out:].astype(y2_ref.dtype)


def dual_pointwise_bn_silu(x_nchw3, w_cat, b_cat, c1_out, thw=512):
    """x_nchw3: (N, Cin, H*W) f32.  Returns two (N, H*W, c) bf16 arrays:
    SiLU(x^T @ w_cat + b_cat) split at c1_out along the output channels."""
    N, Cin, HW = x_nchw3.shape
    Ctot = w_cat.shape[1]
    c2_out = Ctot - c1_out
    thw = min(thw, HW)
    cost = pl.CostEstimate(
        flops=int(2 * N * HW * Cin * Ctot),
        transcendentals=int(N * HW * Ctot),
        bytes_accessed=int(N * HW * Cin * x_nchw3.dtype.itemsize
                           + 2 * N * HW * Ctot + 2 * Cin * Ctot + 4 * Ctot),
    )
    kern = functools.partial(_dual_pw_kernel, c1_out=c1_out)
    return pl.pallas_call(
        kern,
        out_shape=(jax.ShapeDtypeStruct((N, HW, c1_out), jnp.bfloat16),
                   jax.ShapeDtypeStruct((N, HW, c2_out), jnp.bfloat16)),
        grid_spec=pltpu.PrefetchScalarGridSpec(
            num_scalar_prefetch=0,
            grid=(N, pl.cdiv(HW, thw)),
            in_specs=[
                pl.BlockSpec((None, Cin, thw), lambda n, j: (n, 0, j)),
                pl.BlockSpec((Cin, Ctot), lambda n, j: (0, 0)),
                pl.BlockSpec((1, Ctot), lambda n, j: (0, 0)),
            ],
            out_specs=(pl.BlockSpec((None, thw, c1_out), lambda n, j: (n, j, 0)),
                       pl.BlockSpec((None, thw, c2_out), lambda n, j: (n, j, 0))),
        ),
        compiler_params=_compiler_params(("parallel", "parallel")),
        cost_estimate=cost,
    )(x_nchw3, w_cat, b_cat)


# --------------------------------------------------------------------------
# Kernel 2: the ENTIRE Bottleneck chain fused in one kernel.
#   per bottleneck: 1x1 conv -> SiLU -> 3x3 conv (rolls + K-folded width taps)
#                   -> SiLU -> optional residual.  Intermediates stay in VMEM.
# --------------------------------------------------------------------------
def _bottleneck_chain_kernel(y_ref, w1_ref, b1_ref, w2_ref, b2_ref,
                             ml_ref, mr_ref, mt_ref, mb_ref, o_ref, acc_ref,
                             *, n, W, add):
    HW = y_ref.shape[0]
    ml = ml_ref[...]      # (HW,1) 0 where w == 0
    mr = mr_ref[...]      # (HW,1) 0 where w == W-1
    mt = mt_ref[...]      # (HW,1) 0 where h == 0
    mb = mb_ref[...]      # (HW,1) 0 where h == H-1
    y = y_ref[...]        # bf16 (HW, c)

    for i in range(n):    # static unroll over the fused chain
        # 1x1 conv (BN folded) + SiLU, f32 accumulate on the MXU.
        t = jnp.dot(y, w1_ref[i], preferred_element_type=jnp.float32) + b1_ref[i]
        t = _silu(t)                                           # f32 (HW, c)

        # Width taps via XLU rolls + column masks (no padded scratch, no
        # misaligned sublane slices), folded into the contraction dim (K=3c).
        left = ml * pltpu.roll(t, 1, axis=0)                   # t[p-1]
        right = mr * pltpu.roll(t, HW - 1, axis=0)             # t[p+1]
        xcat = jnp.concatenate([left, t, right], axis=-1)      # f32 (HW, 3c)

        # Height taps via whole-row rolls (+/-W) + row masks; 3 MXU matmuls.
        acc_ref[...] = (jnp.dot(xcat.astype(jnp.bfloat16), w2_ref[i, 1],
                                preferred_element_type=jnp.float32) + b2_ref[i])
        acc_ref[...] += mt * jnp.dot(
            pltpu.roll(xcat, W, axis=0).astype(jnp.bfloat16), w2_ref[i, 0],
            preferred_element_type=jnp.float32)
        acc_ref[...] += mb * jnp.dot(
            pltpu.roll(xcat, HW - W, axis=0).astype(jnp.bfloat16), w2_ref[i, 2],
            preferred_element_type=jnp.float32)

        y_new = _silu(acc_ref[...])
        if add:
            y_new = y_new + y.astype(jnp.float32)              # residual (same block)
        y = y_new.astype(jnp.bfloat16)

    o_ref[...] = y


def bottleneck_chain_fused(y1, stacked, masks, W, add):
    """y1: (N, HW, c) bf16.  Runs the whole Bottleneck chain in ONE kernel."""
    N, HW, c = y1.shape
    w1_all, b1_all, w2_all, b2_all = stacked
    n = w1_all.shape[0]
    ml, mr, mt, mb = masks
    kern = functools.partial(_bottleneck_chain_kernel, n=n, W=W, add=add)
    cost = pl.CostEstimate(
        flops=int(20 * N * n * HW * c * c),
        transcendentals=int(2 * N * n * HW * c),
        bytes_accessed=int(4 * N * HW * c + 20 * n * c * c + 8 * n * c + 16 * HW),
    )
    return pl.pallas_call(
        kern,
        out_shape=jax.ShapeDtypeStruct((N, HW, c), jnp.bfloat16),
        grid_spec=pltpu.PrefetchScalarGridSpec(
            num_scalar_prefetch=0,
            grid=(N,),
            in_specs=[
                pl.BlockSpec((None, HW, c), lambda b: (b, 0, 0)),
                pl.BlockSpec((n, c, c), lambda b: (0, 0, 0)),
                pl.BlockSpec((n, 1, c), lambda b: (0, 0, 0)),
                pl.BlockSpec((n, 3, 3 * c, c), lambda b: (0, 0, 0, 0)),
                pl.BlockSpec((n, 1, c), lambda b: (0, 0, 0)),
                pl.BlockSpec((HW, 1), lambda b: (0, 0)),
                pl.BlockSpec((HW, 1), lambda b: (0, 0)),
                pl.BlockSpec((HW, 1), lambda b: (0, 0)),
                pl.BlockSpec((HW, 1), lambda b: (0, 0)),
            ],
            out_specs=pl.BlockSpec((None, HW, c), lambda b: (b, 0, 0)),
            scratch_shapes=[pltpu.VMEM((HW, c), jnp.float32)],
        ),
        compiler_params=_compiler_params(("parallel",)),
        cost_estimate=cost,
    )(y1, w1_all, b1_all, w2_all, b2_all, ml, mr, mt, mb)


# --------------------------------------------------------------------------
# Kernel 3: fused "concat + cv3" -- two accumulated matmuls, no HBM concat.
# --------------------------------------------------------------------------
def _cv3_kernel(ya_ref, yb_ref, wa_ref, wb_ref, b_ref, o_ref):
    acc = jnp.dot(ya_ref[...], wa_ref[...], preferred_element_type=jnp.float32)
    acc = acc + jnp.dot(yb_ref[...], wb_ref[...], preferred_element_type=jnp.float32)
    o_ref[...] = _silu(acc + b_ref[...]).astype(o_ref.dtype)


def cv3_pointwise_bn_silu(ya, yb, w, bias, tm=1024):
    """out = SiLU(concat([ya, yb], -1) @ w + bias) without materializing concat."""
    M, cA = ya.shape
    cB = yb.shape[1]
    Cout = w.shape[1]
    wa = w[:cA]
    wb = w[cA:]
    tm = min(tm, M)
    cost = pl.CostEstimate(
        flops=int(2 * M * (cA + cB) * Cout),
        transcendentals=int(M * Cout),
        bytes_accessed=int(2 * M * (cA + cB) + 4 * M * Cout
                           + 2 * (cA + cB) * Cout + 4 * Cout),
    )
    return pl.pallas_call(
        _cv3_kernel,
        out_shape=jax.ShapeDtypeStruct((M, Cout), jnp.float32),
        grid_spec=pltpu.PrefetchScalarGridSpec(
            num_scalar_prefetch=0,
            grid=(pl.cdiv(M, tm),),
            in_specs=[
                pl.BlockSpec((tm, cA), lambda i: (i, 0)),
                pl.BlockSpec((tm, cB), lambda i: (i, 0)),
                pl.BlockSpec((cA, Cout), lambda i: (0, 0)),
                pl.BlockSpec((cB, Cout), lambda i: (0, 0)),
                pl.BlockSpec((1, Cout), lambda i: (0, 0)),
            ],
            out_specs=pl.BlockSpec((tm, Cout), lambda i: (i, 0)),
        ),
        compiler_params=_compiler_params(("parallel",)),
        cost_estimate=cost,
    )(ya, yb, wa, wb, bias.reshape(1, Cout))


# --------------------------------------------------------------------------
# Parameter construction (deterministic, synthetic; BN folded into w / bias).
# Weights stored in bf16 (MXU-native); biases stay f32 (added to f32 acc).
# --------------------------------------------------------------------------
def make_conv_params(key, c_in, c_out, k):
    kw, kg, kb, km, kv = jax.random.split(key, 5)
    if k == 1:
        w = 0.1 * jax.random.normal(kw, (c_in, c_out), jnp.float32)
    else:
        w = 0.1 * jax.random.normal(kw, (k, k, c_in, c_out), jnp.float32)
    gamma = 1.0 + 0.1 * jax.random.normal(kg, (c_out,), jnp.float32)
    beta = 0.1 * jax.random.normal(kb, (c_out,), jnp.float32)
    mean = 0.1 * jax.random.normal(km, (c_out,), jnp.float32)
    var = 1.0 + 0.1 * jnp.abs(jax.random.normal(kv, (c_out,), jnp.float32))
    eps = 1e-5  # nn.BatchNorm2d default
    scale = gamma / jnp.sqrt(var + eps)
    bias = beta - mean * scale
    return {"w": (w * scale).astype(jnp.bfloat16), "bias": bias}


def make_c3_params(key, c1, c2, n=1, e=0.5):
    c_ = int(c2 * e)
    keys = jax.random.split(key, 3 + 2 * n)
    p = {
        "cv1": make_conv_params(keys[0], c1, c_, 1),
        "cv2": make_conv_params(keys[1], c1, c_, 1),
        "cv3": make_conv_params(keys[2], 2 * c_, c2, 1),
        "m": [],
    }
    for i in range(n):
        p["m"].append({
            "cv1": make_conv_params(keys[3 + 2 * i], c_, c_, 1),   # e=1.0 in Bottleneck
            "cv2": make_conv_params(keys[4 + 2 * i], c_, c_, 3),
        })
    return p


# --------------------------------------------------------------------------
# C3 forward (3 fused Pallas kernels; no HBM concat / pad / 1x1 intermediates,
# no standalone entry transpose, single fused kernel for the whole m-chain).
# --------------------------------------------------------------------------
def c3_forward(x_nchw, params, shortcut=True, thw=512, tm=1024):
    N, C1, H, W = x_nchw.shape
    HW = H * W
    c_ = params["cv1"]["w"].shape[1]

    # cv1 + cv2: one read of x (still NCHW), concatenated weights, one matmul.
    w_cat = jnp.concatenate([params["cv1"]["w"], params["cv2"]["w"]], axis=1)
    b_cat = jnp.concatenate([params["cv1"]["bias"],
                             params["cv2"]["bias"]]).reshape(1, -1)
    y1, y2 = dual_pointwise_bn_silu(x_nchw.reshape(N, C1, HW), w_cat, b_cat,
                                    c1_out=c_, thw=thw)

    # Whole Bottleneck chain in ONE kernel (stacked weights, K-folded 3x3).
    n = len(params["m"])
    if n > 0:
        w1_all = jnp.stack([bp["cv1"]["w"] for bp in params["m"]])
        b1_all = jnp.stack([bp["cv1"]["bias"].reshape(1, c_) for bp in params["m"]])
        w2_all = jnp.stack([bp["cv2"]["w"].reshape(3, 3 * c_, c_)
                            for bp in params["m"]])
        b2_all = jnp.stack([bp["cv2"]["bias"].reshape(1, c_) for bp in params["m"]])
        pos = jnp.arange(HW, dtype=jnp.int32)
        wi = pos % W
        masks = tuple(m.astype(jnp.float32).reshape(HW, 1)
                      for m in ((wi != 0), (wi != W - 1),
                                (pos >= W), (pos < HW - W)))
        y = bottleneck_chain_fused(y1, (w1_all, b1_all, w2_all, b2_all),
                                   masks, W, add=shortcut)
    else:
        y = y1

    # cv3 consumes the chain output and y2 directly (no HBM concat).
    out2d = cv3_pointwise_bn_silu(y.reshape(N * HW, c_), y2.reshape(N * HW, c_),
                                  params["cv3"]["w"], params["cv3"]["bias"], tm=tm)
    return jnp.transpose(out2d.reshape(N, H, W, -1), (0, 3, 1, 2))  # NHWC -> NCHW


# --------------------------------------------------------------------------
# Pure-JAX reference (f32 math on the same bf16-rounded weights).
# --------------------------------------------------------------------------
def _ref_cbs(x, p, k):
    w = p["w"].astype(jnp.float32)
    if k == 1:
        y = jnp.einsum("nhwc,cd->nhwd", x, w)
    else:
        y = jax.lax.conv_general_dilated(
            x, w, (1, 1), "SAME",
            dimension_numbers=("NHWC", "HWIO", "NHWC"))
    y = y + p["bias"]
    return y * jax.nn.sigmoid(y)


def c3_reference(x_nchw, params, shortcut=True):
    x = jnp.transpose(x_nchw, (0, 2, 3, 1))
    y1 = _ref_cbs(x, params["cv1"], 1)
    y2 = _ref_cbs(x, params["cv2"], 1)
    y = y1
    for bp in params["m"]:
        t = _ref_cbs(_ref_cbs(y, bp["cv1"], 1), bp["cv2"], 3)
        y = y + t if shortcut else t
    out = _ref_cbs(jnp.concatenate([y, y2], axis=-1), params["cv3"], 1)
    return jnp.transpose(out, (0, 3, 1, 2))


if __name__ == "__main__":
    key = jax.random.PRNGKey(0)
    kx, kp = jax.random.split(key)

    c1, c2, n = 16, 16, 2
    H = W = 16
    x = jax.random.normal(kx, (2, c1, H, W), jnp.float32)     # NCHW, like PyTorch
    params = make_c3_params(kp, c1, c2, n=n)

    out = jax.block_until_ready(c3_forward(x, params, shortcut=True))
    assert out.shape == (2, c2, H, W), out.shape

    ref = jax.block_until_ready(c3_reference(x, params, shortcut=True))
    np.testing.assert_allclose(np.asarray(out), np.asarray(ref),
                               rtol=2e-2, atol=2e-2)

    print("KERNEL_OK")
</pallas_src>

<mosaic_0001>
module attributes {stable_mosaic.version = 11 : i64} {
  func.func @_dual_pw_kernel(%arg0: i32, %arg1: i32, %arg2: memref<1x16x256xf32, #tpu.memory_space<vmem>>, %arg3: memref<16x16xbf16, #tpu.memory_space<vmem>>, %arg4: memref<1x16xf32, #tpu.memory_space<vmem>>, %arg5: memref<1x256x8xbf16, #tpu.memory_space<vmem>>, %arg6: memref<1x256x8xbf16, #tpu.memory_space<vmem>>) attributes {dimension_semantics = [#tpu.dimension_semantics<parallel>, #tpu.dimension_semantics<parallel>], iteration_bounds = array<i64: 2, 1>, scalar_prefetch = 0 : i64, scratch_operands = 0 : i64, tpu.core_type = #tpu.core_type<tc>, window_params = [{transform_indices = @transform_0, window_bounds = array<i64: 1, 16, 256>}, {pipeline_mode = #tpu.pipeline_mode<synchronous>, transform_indices = @transform_1, window_bounds = array<i64: 16, 16>}, {pipeline_mode = #tpu.pipeline_mode<synchronous>, transform_indices = @transform_2, window_bounds = array<i64: 1, 16>}, {transform_indices = @transform_3, window_bounds = array<i64: 1, 256, 8>}, {transform_indices = @transform_4, window_bounds = array<i64: 1, 256, 8>}]} {
    %c0 = arith.constant 0 : index
    %c0_0 = arith.constant 0 : index
    %c0_1 = arith.constant 0 : index
    %0 = vector.load %arg2[%c0, %c0_0, %c0_1] : memref<1x16x256xf32, #tpu.memory_space<vmem>>, vector<1x16x256xf32>
    %1 = vector.shape_cast %0 : vector<1x16x256xf32> to vector<16x256xf32>
    %2 = arith.truncf %1 : vector<16x256xf32> to vector<16x256xbf16>
    %c0_2 = arith.constant 0 : index
    %c0_3 = arith.constant 0 : index
    %3 = vector.load %arg3[%c0_2, %c0_3] : memref<16x16xbf16, #tpu.memory_space<vmem>>, vector<16x16xbf16>
    %cst = arith.constant dense<0.000000e+00> : vector<256x16xf32>
    %4 = tpu.matmul %2, %3, %cst {dimension_numbers = #tpu.dot_dimension_numbers<[0], [0], [1], [1], [0, 1, 1, 1], [], []>} : vector<16x256xbf16>, vector<16x16xbf16>, vector<256x16xf32> -> vector<256x16xf32>
    %c0_4 = arith.constant 0 : index
    %c0_5 = arith.constant 0 : index
    %5 = vector.load %arg4[%c0_4, %c0_5] : memref<1x16xf32, #tpu.memory_space<vmem>>, vector<1x16xf32>
    %6 = vector.broadcast %5 : vector<1x16xf32> to vector<256x16xf32>
    %7 = arith.addf %4, %6 : vector<256x16xf32>
    %8 = arith.negf %7 : vector<256x16xf32>
    %9 = math.exp %8 : vector<256x16xf32>
    %cst_6 = arith.constant 1.000000e+00 : f32
    %10 = vector.broadcast %cst_6 : f32 to vector<256x16xf32>
    %11 = arith.addf %10, %9 : vector<256x16xf32>
    %12 = arith.divf %10, %11 : vector<256x16xf32>
    %13 = arith.mulf %7, %12 : vector<256x16xf32>
    %14 = vector.extract_strided_slice %13 {offsets = [0, 0], sizes = [256, 8], strides = [1, 1]} : vector<256x16xf32> to vector<256x8xf32>
    %15 = arith.truncf %14 : vector<256x8xf32> to vector<256x8xbf16>
    %c0_7 = arith.constant 0 : index
    %c0_8 = arith.constant 0 : index
    %c0_9 = arith.constant 0 : index
    %16 = vector.load %arg5[%c0_7, %c0_8, %c0_9] : memref<1x256x8xbf16, #tpu.memory_space<vmem>>, vector<1x256x8xbf16>
    %17 = vector.shape_cast %16 : vector<1x256x8xbf16> to vector<256x8xbf16>
    %18 = vector.shape_cast %15 : vector<256x8xbf16> to vector<1x256x8xbf16>
    tpu.vector_store %arg5[%c0_7, %c0_8, %c0_9], %18 {strides = array<i32>} : memref<1x256x8xbf16, #tpu.memory_space<vmem>>, vector<1x256x8xbf16>,
    %19 = vector.extract_strided_slice %13 {offsets = [0, 8], sizes = [256, 8], strides = [1, 1]} : vector<256x16xf32> to vector<256x8xf32>
    %20 = arith.truncf %19 : vector<256x8xf32> to vector<256x8xbf16>
    %c0_10 = arith.constant 0 : index
    %c0_11 = arith.constant 0 : index
    %c0_12 = arith.constant 0 : index
    %21 = vector.load %arg6[%c0_10, %c0_11, %c0_12] : memref<1x256x8xbf16, #tpu.memory_space<vmem>>, vector<1x256x8xbf16>
    %22 = vector.shape_cast %21 : vector<1x256x8xbf16> to vector<256x8xbf16>
    %23 = vector.shape_cast %20 : vector<256x8xbf16> to vector<1x256x8xbf16>
    tpu.vector_store %arg6[%c0_10, %c0_11, %c0_12], %23 {strides = array<i32>} : memref<1x256x8xbf16, #tpu.memory_space<vmem>>, vector<1x256x8xbf16>,
    return
  }
  func.func @transform_0(%arg0: i32, %arg1: i32) -> (i32, i32, i32) {
    %c0_i32 = arith.constant 0 : i32
    %c0_i32_0 = arith.constant 0 : i32
    return %arg0, %c0_i32, %arg1 : i32, i32, i32
  }
  func.func @transform_1(%arg0: i32, %arg1: i32) -> (i32, i32) {
    %c0_i32 = arith.constant 0 : i32
    %c0_i32_0 = arith.constant 0 : i32
    %c0_i32_1 = arith.constant 0 : i32
    return %c0_i32, %c0_i32_0 : i32, i32
  }
  func.func @transform_2(%arg0: i32, %arg1: i32) -> (i32, i32) {
    %c0_i32 = arith.constant 0 : i32
    %c0_i32_0 = arith.constant 0 : i32
    %c0_i32_1 = arith.constant 0 : i32
    return %c0_i32, %c0_i32_0 : i32, i32
  }
  func.func @transform_3(%arg0: i32, %arg1: i32) -> (i32, i32, i32) {
    %c0_i32 = arith.constant 0 : i32
    %c0_i32_0 = arith.constant 0 : i32
    return %arg0, %arg1, %c0_i32 : i32, i32, i32
  }
  func.func @transform_4(%arg0: i32, %arg1: i32) -> (i32, i32, i32) {
    %c0_i32 = arith.constant 0 : i32
    %c0_i32_0 = arith.constant 0 : i32
    return %arg0, %arg1, %c0_i32 : i32, i32, i32
  }
}

</mosaic_0001>

<bundles_post_ra>
// kernel: tpu_custom_call.1
= control target key start
LH: loop header
LB: loop body
LE: loop exit
PB: predicated region body
PF: predicated region fallthrough
CT: control target
= control target key end

     0   :  { %10 = vsyncpa [#allocation3], 0  ;;  %s2338_s0 = inlined_call_operand.hbm [shape: f32[2,16,256], index: 0, kind: input, shape index: {}]   ;;  %s2339_s1 = inlined_call_operand.hbm [shape: bf16[16,16], index: 1, kind: input, shape index: {}]   ;;  %s2340_s2 = inlined_call_operand.vmem [shape: f32[1,16], index: 2, kind: input, shape index: {}]   ;;  %s2341_s3 = inlined_call_operand.vmem [shape: bf16[2,256,8], index: 3, kind: output, shape index: {0}]   ;;  %s2342_s4 = inlined_call_operand.vmem [shape: bf16[2,256,8], index: 4, kind: output, shape index: {1}]  }
   0x1   :  { %12 = vsyncpa [#allocation3 + $0x1], 0 }
   0x2   :  { %13 = vsyncpa [#allocation5], 0  ;;  %s1751_s15 = smov 0   ;;  %s1753_s16 = smov 0  }
   0x3   :  { %s1755_s17 = smov 0   ;;  %s1757_s18 = smov 0  }
   0x4   :  { %s1759_s19 = smov 0   ;;  %s1761_s20 = smov 0  }
   0x5 LB: > { %s1217_s21 = sadd.s32 4294967295, %s1717_s20   ;;  %p53_p0 = scmp.ne.s32.totalorder %s1701_s16, %s1697_s15  ;;  %s1717_s20 = sphi %s1761_s20, %s19_s20   ;;  %s1713_s19 = sphi %s1759_s19, %s2359_s19   ;;  %s1709_s18 = sphi %s1757_s18, %s2358_s18   ;;  %s1705_s17 = sphi %s1755_s17, %s2357_s17   ;;  %s1701_s16 = sphi %s1753_s16, %s2356_s16   ;;  %s1697_s15 = sphi %s1751_s15, %s2355_s15  }
   0x6   : > { %p1781_p1 = scmp.eq.s32.totalorder %s1217_s21, 0  ;;  %p1219_p2 = scmp.ge.s32.totalorder %s1717_s20, 1 }
   0x7   : > { %p162_p3 = scmp.lt.s32.totalorder %s1717_s20, 3  ;;  %s1719_s25 = smov [#allocation4]  }
   0x8   : > { %s2347_s22 = scalar_select %p1781_p1, 1, 0 }
   0x9   : > { %p1789_p4 = por %p1781_p1, %p53_p0  ;;  %p1793_p5 = pnand %p1219_p2, %p162_p3 }
   0xa   : > { %s174_s26 = sshll.u32 %s1719_s25, 4  ;;  %s31_s28 = sadd.s32 1, %s1713_s19  ;;  %s175_s26 = int_to_ptr.vmem [resolvable:$true] %s174_s26 }
   0xb   : > { %s2348_s23 = scalar_select %p1789_p4, 1, 0 }
   0xc   : > { %s2349_s24 = scalar_select %p1793_p5, 1, 0 }
   0xd   : > { %p1410_p6 = pneg %p1793_p5  ;;  %s1605_s5 = scalar_lea.hbm %s2339_s1, 128 }
   0xe   : > { %p1606_p8 = scmp.ne.s32.totalorder %s2339_s1, %s1605_s5  ;;  %p1612_p12 = scmp.lt.u32.totalorder %s1605_s5, %s2339_s1 }
   0xf   : > { %p1801_p7 = pnand %p1410_p6, %p1781_p1 }
  0x11   : > { %p1607_p9 = pneg %p1801_p7 }
  0x13   : > { %p1608_p10 = pnand %p1607_p9, %p1606_p8 }
  0x15   : > { %p1609_p11 = pneg %p1608_p10 }
  0x17   : > { %p1614_p13 = pnand %p1612_p12, %p1609_p11 }
  0x19   : > { %1617 = shalt.err (!%p1614_p13)
}
  0x1a   : > { %s1618_s10 = scalar_lea.vmem %s175_s26, 128  ;;  %p1626_p6 = scmp.lt.s32.totalorder %s175_s26, %s175_s26 }
  0x1b   : > { %p1619_p0 = scmp.ne.s32.totalorder %s175_s26, %s1618_s10  ;;  %p1627_p1 = scmp.lt.s32.totalorder %s1618_s10, %s1618_s10 }
  0x1d   : > { %p1621_p2 = pnand %p1619_p0, %p1607_p9  ;;  %p1628_p4 = por %p1627_p1, %p1626_p6 }
  0x1f   : > { %p1622_p3 = pneg %p1621_p2 }
  0x21   : > { %p1629_p5 = pnand %p1628_p4, %p1622_p3 }
  0x23   : > { %1632 = shalt.err (!%p1629_p5)
}
  0x24   : > { %s1720_s11 = smov 64   ;;  %s1721_s12 = smov 4  }
  0x25   : > { %1413 = dma.hbm_to_vmem [thread:$0]  (!%p1801_p7), %s2339_s1, 128, %s175_s26, [#allocation5], %s1720_s11, %s1720_s11, %s1721_s12  }
  0x26   : > { %p33_p1 = scmp.ge.s32.totalorder %s31_s28, 2  ;;  %s40_s15 = sadd.s32 1, %s1705_s17 }
  0x27   : > { %p47_p4 = scmp.ne.s32.totalorder %s1705_s17, %s1701_s16  ;;  %p48_p5 = scmp.eq.s32.totalorder %s1717_s20, 0 }
  0x28   : > { %s2361_s28 = smov (%p33_p1, %s31_s28), 0  ;;  %p1419_p9 = scmp.lt.s32.totalorder %s1717_s20, 2 }
  0x29   : > { %p49_p8 = por %p48_p5, %p47_p4  ;;  %s35_s21 = ssub.s32 %s1713_s19, %s2361_s28 }
  0x2a   : > { %s191_s25 = sand.u32 1, %s1705_s17   ;;  %p38_p10 = scmp.eq.s32.totalorder %s35_s21, 0 }
  0x2b   : > { %s1222_s29 = sshll.u32 %s191_s25, 5  ;;  %s1316_s30 = sshll.u32 %s1713_s19, 9 }
  0x2c   : > { %s1834_s5 = scalar_select %p38_p10, %s1705_s17, %s40_s15  }
  0x2d   : > { %s1839_s26 = scalar_lea.hbm %s2338_s0, %s1316_s30  ;;  %s195_s7 = scalar_lea.vmem [#allocation2], %s1222_s29 }
  0x2e   : > { %s204_s8 = sshll.u32 %s195_s7, 4  ;;  %p1841_p7 = pnand %p1419_p9, %p49_p8  ;;  %s1845_s8 = int_to_ptr.vmem [resolvable:$true] %s204_s8 }
  0x2f   : > { %s1847_s10 = scalar_lea.sflag [#allocation3], %s191_s25  ;;  %s1633_s11 = scalar_lea.hbm %s1839_s26, 512 }
  0x30   : > { %p1634_p11 = scmp.ne.s32.totalorder %s1839_s26, %s1633_s11  ;;  %p1635_p12 = pneg %p1841_p7 }
  0x31   : > { %s1638_s14 = scalar_lea.hbm %s2338_s0, 1024  ;;  %p1639_p2 = scmp.lt.u32.totalorder %s1839_s26, %s2338_s0 }
  0x32   : > { %p1636_p13 = pnand %p1635_p12, %p1634_p11  ;;  %p1640_p3 = scmp.lt.u32.totalorder %s1638_s14, %s1633_s11 }
  0x33   : > { %p1642_p1 = scmp.lt.u32.totalorder %s1633_s11, %s1839_s26 }
  0x34   : > { %p1637_p0 = pneg %p1636_p13  ;;  %p1641_p6 = por %p1640_p3, %p1639_p2 }
  0x36   : > { %p1643_p4 = por %p1642_p1, %p1641_p6 }
  0x38   : > { %p1644_p5 = pnand %p1643_p4, %p1637_p0 }
  0x3a   : > { %1647 = shalt.err (!%p1644_p5)
}
  0x3b   : > { %s1648_s25 = scalar_lea.vmem %s1845_s8, 512  ;;  %s1722_s29 = smov [#allocation2]  }
  0x3c   : > { %p1649_p8 = scmp.ne.s32.totalorder %s1845_s8, %s1648_s25  ;;  %s1653_s30 = sshll.u32 %s1722_s29, 4  ;;  %s1654_s30 = int_to_ptr.vmem [resolvable:$false] %s1653_s30 }
  0x3d   : > { %s1655_s27 = scalar_lea.vmem %s1654_s30, 1024  ;;  %p1656_p11 = scmp.lt.s32.totalorder %s1845_s8, %s1654_s30 }
  0x3e   : > { %p1651_p9 = pnand %p1649_p8, %p1635_p12  ;;  %p1657_p13 = scmp.lt.s32.totalorder %s1655_s27, %s1648_s25 }
  0x40   : > { %p1652_p10 = pneg %p1651_p9  ;;  %p1658_p2 = por %p1657_p13, %p1656_p11 }
  0x42   : > { %p1659_p3 = pnand %p1658_p2, %p1652_p10 }
  0x44   : > { %1662 = shalt.err (!%p1659_p3)
}
  0x45   : > { %s1723_s6 = smov 256   ;;  %s1724_s7 = smov 16  }
  0x46   : > { %1417 = dma.hbm_to_vmem [thread:$0]  (!%p1841_p7), %s1839_s26, 512, %s1845_s8, %s1847_s10, %s1723_s6, %s1723_s6, %s1724_s7  }
  0x47   : > { %p2352_p12 = scmp.ne.s32.totalorder %s2349_s24, 0 }
  0x48   : > { %s218_s11 = sand.u32 (!%p2352_p12), 1, %s1701_s16   ;;  %p2353_p0 = scmp.ne.s32.totalorder (!%p2352_p12), %s2348_s23, 0 }
  0x49   : > { %216 = sbr.rel (%p2352_p12) target bundleno = 676 (0x2a4), region = 32  ;;  %s1226_s12 = sshll.u32 (!%p2352_p12), %s218_s11, 5 }
  0x4a   : > { %s219_s13 = scalar_lea.sflag (!%p2352_p12), [#allocation3], %s218_s11  ;;  %s222_s14 = scalar_lea.vmem (!%p2352_p12), [#allocation2], %s1226_s12 }
  0x50   : > { %1688 = dma.done.wait (%p2353_p0), %s219_s13, 512  }
  0x51   : > { %1690 = vsyncadd (%p2353_p0), %s219_s13, 4294966784  ;;  %p2354_p6 = scmp.ne.s32.totalorder %s2347_s22, 0 }
  0x53   : > { %1692 = dma.done.wait (%p2354_p6), [#allocation5], 128  }
  0x54   : > { %1694 = vsyncadd (%p2354_p6), [#allocation5], 4294967168  ;;  %v286_v0 = vld [vmem:[%s222_s14] sm:$0xff]  ;;  %v288_v1 = vld [vmem:[%s222_s14 + $0x10] sm:$0xff]  ;;  %vm339_vm0 = vcmask 130048   ;;  %p266_p7 = scmp.lt.s32.totalorder %s1709_s18, 1 }
  0x55   : > { %v290_v2 = vpack.c.bf16 %v288_v1, %v286_v0  ;;  %v1476_v3 = vld [vmem:[#allocation4] sm:$0xff]   ;;  %v287_v4 = vld [vmem:[%s222_s14 + $0x8] sm:$0xff]  ;;  %v289_v5 = vld [vmem:[%s222_s14 + $0x18] sm:$0xff]  ;;  %vm901_vm1 = vcmask 60416   ;;  %s1725_s10 = smov 120  }
  0x56   : > { %1368 = vmatprep.subr.bf16.mxu0 %v1476_v3  ;;  %1402 = vmatprep.subr.bf16.mxu1 %v1476_v3  ;;  %v291_v6 = vpack.c.bf16 %v289_v5, %v287_v4  ;;  %v1905_v23 = vld [vmem:[%s2340_s2] ss:$0 sm:$0xff]  ;;  %s2363_s18 = smov (!%p266_p7, %s1709_s18), 1 }
  0x57   : > { %301 = vxpose.xlu0.c.b16.start.end [1/1] (short) %v290_v2, 128  ;;  %1369 = vmatpush3.bf16.msra.mxu0 %v1476_v3  ;;  %s1317_s24 = sshll.u32 %s2363_s18, 7 }
  0x58   : > { %1403 = vmatpush3.bf16.msra.mxu1 %v1476_v3  ;;  %s1983_s9 = scalar_lea.vmem %s2341_s3, %s1317_s24  ;;  %s2249_s25 = scalar_lea.vmem %s2342_s4, %s1317_s24 }
  0x74   : > { %317 = vxpose.xlu0.c.b16.start.end [1/1] (short) %v291_v6, 128 }
  0xbd   : > { %v309_v7 = vpop.trf.xlu0 }
  0xbe   : > { %1370 = vmatprep.mubr.msk.bf16.mxu0 %vm339_vm0, %v309_v7 }
  0xc1   : > { %v310_v8 = vpop.trf.xlu0 }
  0xc2   : > { %1371 = vmatmul.mubr.msk.bf16.vlgmr.msra.gmra.mrb[0].mxu0 %vm339_vm0, %v310_v8 }
  0xc5   : > { %v311_v9 = vpop.trf.xlu0 }
  0xc6   : > { %1374 = vmatprep.mubr.msk.bf16.mxu0 %vm339_vm0, %v311_v9 }
  0xc9   : > { %v312_v10 = vpop.trf.xlu0 }
  0xca   : > { %1375 = vmatmul.mubr.msk.bf16.gmra.mrb[4].mxu0 %vm339_vm0, %v312_v10 }
  0xcd   : > { %v313_v11 = vpop.trf.xlu0 }
  0xce   : > { %1378 = vmatprep.mubr.msk.bf16.mxu0 %vm339_vm0, %v313_v11 }
  0xd1   : > { %v314_v12 = vpop.trf.xlu0 }
  0xd2   : > { %1379 = vmatmul.mubr.msk.bf16.gmra.mrb[8].mxu0 %vm339_vm0, %v314_v12 }
  0xd5   : > { %v315_v13 = vpop.trf.xlu0 }
  0xd6   : > { %1382 = vmatprep.mubr.msk.bf16.mxu0 %vm339_vm0, %v315_v13 }
  0xd9   : > { %v316_v14 = vpop.trf.xlu0 }
  0xda   : > { %1383 = vmatmul.mubr.msk.bf16.gmra.mrb[12].mxu0 %vm339_vm0, %v316_v14 }
  0xdd   : > { %v325_v15 = vpop.trf.xlu0 }
  0xde   : > { %1386 = vmatprep.mubr.msk.bf16.mxu1 %vm339_vm0, %v325_v15 }
  0xe1   : > { %v326_v16 = vpop.trf.xlu0 }
  0xe2   : > { %1387 = vmatmul.mubr.msk.bf16.vlgmr.msra.gmra.mrb[0].mxu1 %vm339_vm0, %v326_v16 }
  0xe5   : > { %v327_v17 = vpop.trf.xlu0 }
  0xe6   : > { %1390 = vmatprep.mubr.msk.bf16.mxu1 %vm339_vm0, %v327_v17 }
  0xe9   : > { %v328_v18 = vpop.trf.xlu0 }
  0xea   : > { %1391 = vmatmul.mubr.msk.bf16.gmra.mrb[4].mxu1 %vm339_vm0, %v328_v18 }
  0xed   : > { %v329_v19 = vpop.trf.xlu0 }
  0xee   : > { %1394 = vmatprep.mubr.msk.bf16.mxu1 %vm339_vm0, %v329_v19 }
  0xf1   : > { %v330_v20 = vpop.trf.xlu0 }
  0xf2   : > { %1395 = vmatmul.mubr.msk.bf16.gmra.mrb[8].mxu1 %vm339_vm0, %v330_v20 }
  0xf5   : > { %v331_v21 = vpop.trf.xlu0 }
  0xf6   : > { %1398 = vmatprep.mubr.msk.bf16.mxu1 %vm339_vm0, %v331_v21 }
  0xf9   : > { %v332_v22 = vpop.trf.xlu0 }
  0xfa   : > { %1399 = vmatmul.mubr.msk.bf16.gmra.mrb[12].mxu1 %vm339_vm0, %v332_v22 }
 0x195   : > { %v1372_v24 = vpop.f32.mrb[0].mxu0 }
 0x196   : > { %v1908_v25 = vadd.f32 %v1372_v24, %v1905_v23  ;;  %v422_v26 = vpop.f32.mrb[1].mxu0 }
 0x197   : > { %v1911_v27 = vadd.f32 %v1905_v23, %v422_v26  ;;  %v1373_v28 = vpop.f32.mrb[2].mxu0 }
 0x198   : > { %v1252_v29 = vmul.f32 -1.442695, %v1908_v25  ;;  %v1915_v30 = vadd.f32 %v1373_v28, %v1905_v23  ;;  %v425_v31 = vpop.f32.mrb[3].mxu0 }
 0x199   : > { %v1250_v32 = vmul.f32 -1.442695, %v1911_v27  ;;  %v1919_v33 = vadd.f32 %v1905_v23, %v425_v31 }
 0x19a   : > { %1477 = vpow2.f32 %v1252_v29  ;;  %v1253_v34 = vmul.f32 -1.442695, %v1915_v30 }
 0x19b   : > { %1479 = vpow2.f32 %v1250_v32  ;;  %v1251_v35 = vmul.f32 -1.442695, %v1919_v33 }
 0x19c   : > { %1481 = vpow2.f32 %v1253_v34 }
 0x19d   : > { %1483 = vpow2.f32 %v1251_v35  ;;  %v1376_v36 = vpop.f32.mrb[4].mxu0 }
 0x19e   : > { %v1924_v37 = vadd.f32 %v1376_v36, %v1905_v23  ;;  %v438_v38 = vpop.f32.mrb[5].mxu0 }
 0x19f   : > { %v1927_v39 = vadd.f32 %v1905_v23, %v438_v38  ;;  %v1377_v40 = vpop.f32.mrb[6].mxu0 }
 0x1a0   : > { %v1256_v41 = vmul.f32 -1.442695, %v1924_v37  ;;  %v1931_v42 = vadd.f32 %v1377_v40, %v1905_v23  ;;  %v441_v43 = vpop.f32.mrb[7].mxu0 }
 0x1a1   : > { %v1254_v44 = vmul.f32 -1.442695, %v1927_v39  ;;  %v1935_v45 = vadd.f32 %v1905_v23, %v441_v43 }
 0x1a2   : > { %1485 = vpow2.f32 %v1256_v41  ;;  %v1257_v46 = vmul.f32 -1.442695, %v1931_v42 }
 0x1a3   : > { %1487 = vpow2.f32 %v1254_v44  ;;  %v1255_v47 = vmul.f32 -1.442695, %v1935_v45 }
 0x1a4   : > { %v1478_v48 = vpop.eup %1477  ;;  %1489 = vpow2.f32 %v1257_v46 }
 0x1a5   : > { %v1480_v49 = vpop.eup %1479  ;;  %v647_v50 = vadd.f32 1.0, %v1478_v48  ;;  %1491 = vpow2.f32 %v1255_v47  ;;  %v1380_v51 = vpop.f32.mrb[8].mxu0 }
 0x1a6   : > { %v1482_v52 = vpop.eup %1481  ;;  %v645_v53 = vadd.f32 1.0, %v1480_v49  ;;  %v1940_v54 = vadd.f32 %v1380_v51, %v1905_v23  ;;  %v454_v55 = vpop.f32.mrb[9].mxu0 }
 0x1a7   : > { %v1484_v56 = vpop.eup %1483  ;;  %1493 = vrcp.f32 %v647_v50  ;;  %v648_v57 = vadd.f32 1.0, %v1482_v52  ;;  %v1943_v58 = vadd.f32 %v1905_v23, %v454_v55  ;;  %v1381_v59 = vpop.f32.mrb[10].mxu0 }
 0x1a8   : > { %1495 = vrcp.f32 %v645_v53  ;;  %v646_v60 = vadd.f32 1.0, %v1484_v56  ;;  %v1260_v61 = vmul.f32 -1.442695, %v1940_v54  ;;  %v1948_v62 = vadd.f32 %v1381_v59, %v1905_v23  ;;  %v457_v63 = vpop.f32.mrb[11].mxu0 }
 0x1a9   : > { %1497 = vrcp.f32 %v648_v57  ;;  %v1258_v0 = vmul.f32 -1.442695, %v1943_v58  ;;  %v1952_v1 = vadd.f32 %v1905_v23, %v457_v63 }
 0x1aa   : > { %1499 = vrcp.f32 %v646_v60  ;;  %v1261_v2 = vmul.f32 -1.442695, %v1948_v62 }
 0x1ab   : > { %1501 = vpow2.f32 %v1260_v61  ;;  %v1259_v3 = vmul.f32 -1.442695, %v1952_v1 }
 0x1ac   : > { %v1486_v4 = vpop.eup %1485  ;;  %1503 = vpow2.f32 %v1258_v0 }
 0x1ad   : > { %v1488_v5 = vpop.eup %1487  ;;  %v651_v6 = vadd.f32 1.0, %v1486_v4  ;;  %1505 = vpow2.f32 %v1261_v2  ;;  %v1384_v7 = vpop.f32.mrb[12].mxu0 }
 0x1ae   : > { %v1490_v8 = vpop.eup %1489  ;;  %v649_v9 = vadd.f32 1.0, %v1488_v5  ;;  %1507 = vpow2.f32 %v1259_v3  ;;  %v1962_v10 = vadd.f32 %v1384_v7, %v1905_v23  ;;  %v470_v11 = vpop.f32.mrb[13].mxu0 }
 0x1af   : > { %v1492_v12 = vpop.eup %1491  ;;  %1509 = vrcp.f32 %v651_v6  ;;  %v652_v13 = vadd.f32 1.0, %v1490_v8  ;;  %v1965_v14 = vadd.f32 %v1905_v23, %v470_v11  ;;  %v1385_v15 = vpop.f32.mrb[14].mxu0 }
 0x1b0   : > { %1511 = vrcp.f32 %v649_v9  ;;  %v650_v16 = vadd.f32 1.0, %v1492_v12  ;;  %v1264_v17 = vmul.f32 -1.442695, %v1962_v10  ;;  %v1970_v18 = vadd.f32 %v1385_v15, %v1905_v23  ;;  %v473_v19 = vpop.f32.mrb[15].mxu0 }
 0x1b1   : > { %v1494_v20 = vpop.eup %1493  ;;  %1513 = vrcp.f32 %v652_v13  ;;  %v1262_v21 = vmul.f32 -1.442695, %v1965_v14  ;;  %v1974_v22 = vadd.f32 %v1905_v23, %v473_v19 }
 0x1b2   : > { %v1496_v24 = vpop.eup %1495  ;;  %1515 = vrcp.f32 %v650_v16  ;;  %v1265_v26 = vmul.f32 -1.442695, %v1970_v18  ;;  %v743_v28 = vmul.f32 %v1494_v20, %v1908_v25 }
 0x1b3   : > { %v1498_v29 = vpop.eup %1497  ;;  %v741_v31 = vmul.f32 %v1496_v24, %v1911_v27  ;;  %1517 = vpow2.f32 %v1264_v17  ;;  %v1263_v32 = vmul.f32 -1.442695, %v1974_v22 }
 0x1b4   : > { %v1500_v34 = vpop.eup %1499  ;;  %v744_v35 = vmul.f32 %v1498_v29, %v1915_v30  ;;  %1519 = vpow2.f32 %v1262_v21  ;;  %v1321_v36 = vpack.c.bf16 %v743_v28, %v743_v28 }
 0x1b5   : > { %v1502_v25 = vpop.eup %1501  ;;  %v1988_v38 = vpack.c.bf16 %v741_v31, %v741_v31  ;;  %v742_v40 = vmul.f32 %v1500_v34, %v1919_v33  ;;  %1521 = vpow2.f32 %v1265_v26  ;;  %v1388_v41 = vpop.f32.mrb[0].mxu1 }
 0x1b6   : > { %v1504_v43 = vpop.eup %1503  ;;  %v1991_v27 = vpack.c.bf16 %v744_v35, %v744_v35  ;;  %v655_v44 = vadd.f32 1.0, %v1502_v25  ;;  %1523 = vpow2.f32 %v1263_v32  ;;  %v1994_v46 = vadd.f32 %v1388_v41, %v1905_v23  ;;  %938 = vrot.lane.b32.xlu1 %v1321_v36, %s1725_s10  ;;  %904 = vst.msk [vmem:[%s1983_s9 + $0x8] sm:$0xf] %vm901_vm1, %v1321_v36  ;;  %v486_v30 = vpop.f32.mrb[1].mxu1 }
 0x1b7   : > { %v1506_v47 = vpop.eup %1505  ;;  %902 = vst.msk [vmem:[%s1983_s9] sm:$0xf] %vm901_vm1, %v1988_v38  ;;  %v2002_v33 = vpack.c.bf16 %v742_v40, %v742_v40  ;;  %v653_v48 = vadd.f32 1.0, %v1504_v43  ;;  %v2005_v49 = vadd.f32 %v1905_v23, %v486_v30  ;;  %v1389_v50 = vpop.f32.mrb[2].mxu1 }
 0x1b8   : > { %v1508_v51 = vpop.eup %1507  ;;  %905 = vst.msk [vmem:[%s1983_s9 + $0xc] sm:$0xf] %vm901_vm1, %v1991_v27  ;;  %1525 = vrcp.f32 %v655_v44  ;;  %v656_v52 = vadd.f32 1.0, %v1506_v47  ;;  %v1268_v53 = vmul.f32 -1.442695, %v1994_v46  ;;  %v2012_v55 = vadd.f32 %v1389_v50, %v1905_v23  ;;  %v489_v56 = vpop.f32.mrb[3].mxu1 }
 0x1b9   : > { %v1510_v57 = vpop.eup %1509  ;;  %903 = vst.msk [vmem:[%s1983_s9 + $0x4] sm:$0xf] %vm901_vm1, %v2002_v33  ;;  %1527 = vrcp.f32 %v653_v48  ;;  %v654_v59 = vadd.f32 1.0, %v1508_v51  ;;  %v1266_v60 = vmul.f32 -1.442695, %v2005_v49  ;;  %v2019_v61 = vadd.f32 %v1905_v23, %v489_v56 }
 0x1ba   : > { %v1512_v63 = vpop.eup %1511  ;;  %v747_v0 = vmul.f32 %v1510_v57, %v1924_v37  ;;  %1529 = vrcp.f32 %v656_v52  ;;  %v1269_v2 = vmul.f32 -1.442695, %v2012_v55 }
 0x1bb   : > { %v1514_v3 = vpop.eup %1513  ;;  %v745_v4 = vmul.f32 %v1512_v63, %v1927_v39  ;;  %1531 = vrcp.f32 %v654_v59  ;;  %v1267_v5 = vmul.f32 -1.442695, %v2019_v61 }
 0x1bc   : > { %v1516_v6 = vpop.eup %1515  ;;  %v2025_v7 = vpack.c.bf16 %v747_v0, %v747_v0  ;;  %v748_v8 = vmul.f32 %v1514_v3, %v1931_v42  ;;  %1533 = vpow2.f32 %v1268_v53 }
 0x1bd   : > { %v1518_v9 = vpop.eup %1517  ;;  %v2028_v11 = vpack.c.bf16 %v745_v4, %v745_v4  ;;  %v746_v37 = vmul.f32 %v1516_v6, %v1935_v45  ;;  %1535 = vpow2.f32 %v1266_v60  ;;  %v1392_v12 = vpop.f32.mrb[4].mxu1 }
 0x1be   : > { %v1520_v13 = vpop.eup %1519  ;;  %908 = vst.msk [vmem:[%s1983_s9 + $0x18] sm:$0xf] %vm901_vm1, %v2025_v7  ;;  %v2034_v39 = vpack.c.bf16 %v748_v8, %v748_v8  ;;  %v659_v15 = vadd.f32 1.0, %v1518_v9  ;;  %1537 = vpow2.f32 %v1269_v2  ;;  %v2037_v16 = vadd.f32 %v1392_v12, %v1905_v23  ;;  %v502_v42 = vpop.f32.mrb[5].mxu1 }
 0x1bf   : > { %v1522_v17 = vpop.eup %1521  ;;  %906 = vst.msk [vmem:[%s1983_s9 + $0x10] sm:$0xf] %vm901_vm1, %v2028_v11  ;;  %v2042_v45 = vpack.c.bf16 %v746_v37, %v746_v37  ;;  %v657_v19 = vadd.f32 1.0, %v1520_v13  ;;  %1539 = vpow2.f32 %v1267_v5  ;;  %v2045_v20 = vadd.f32 %v1905_v23, %v502_v42  ;;  %v1393_v21 = vpop.f32.mrb[6].mxu1 }
 0x1c0   : > { %v1524_v24 = vpop.eup %1523  ;;  %909 = vst.msk [vmem:[%s1983_s9 + $0x1c] sm:$0xf] %vm901_vm1, %v2034_v39  ;;  %1541 = vrcp.f32 %v659_v15  ;;  %v660_v26 = vadd.f32 1.0, %v1522_v17  ;;  %v1272_v28 = vmul.f32 -1.442695, %v2037_v16  ;;  %v2052_v29 = vadd.f32 %v1393_v21, %v1905_v23  ;;  %v505_v31 = vpop.f32.mrb[7].mxu1 }
 0x1c1   : > { %907 = vst.msk [vmem:[%s1983_s9 + $0x14] sm:$0xf] %vm901_vm1, %v2042_v45  ;;  %1543 = vrcp.f32 %v657_v19  ;;  %v658_v32 = vadd.f32 1.0, %v1524_v24  ;;  %v1270_v34 = vmul.f32 -1.442695, %v2045_v20  ;;  %v2059_v35 = vadd.f32 %v1905_v23, %v505_v31 }
 0x1c2   : > { %v1526_v36 = vpop.eup %1525  ;;  %1545 = vrcp.f32 %v660_v26  ;;  %v1273_v25 = vmul.f32 -1.442695, %v2052_v29 }
 0x1c3   : > { %v1528_v40 = vpop.eup %1527  ;;  %v751_v41 = vmul.f32 %v1526_v36, %v1940_v54  ;;  %1547 = vrcp.f32 %v658_v32  ;;  %v1271_v43 = vmul.f32 -1.442695, %v2059_v35 }
 0x1c4   : > { %v1530_v44 = vpop.eup %1529  ;;  %v749_v30 = vmul.f32 %v1528_v40, %v1943_v58  ;;  %1549 = vpow2.f32 %v1272_v28 }
 0x1c5   : > { %v1532_v47 = vpop.eup %1531  ;;  %v2065_v48 = vpack.c.bf16 %v751_v41, %v751_v41  ;;  %v752_v50 = vmul.f32 %v1530_v44, %v1948_v62  ;;  %1551 = vpow2.f32 %v1270_v34  ;;  %v1396_v51 = vpop.f32.mrb[8].mxu1 }
 0x1c6   : > { %v1534_v52 = vpop.eup %1533  ;;  %v2068_v53 = vpack.c.bf16 %v749_v30, %v749_v30  ;;  %v750_v54 = vmul.f32 %v1532_v47, %v1952_v1  ;;  %1553 = vpow2.f32 %v1273_v25  ;;  %v2072_v56 = vadd.f32 %v1396_v51, %v1905_v23  ;;  %v518_v58 = vpop.f32.mrb[9].mxu1 }
 0x1c7   : > { %v1536_v57 = vpop.eup %1535  ;;  %912 = vst.msk [vmem:[%s1983_s9 + $0x28] sm:$0xf] %vm901_vm1, %v2065_v48  ;;  %v2077_v59 = vpack.c.bf16 %v752_v50, %v752_v50  ;;  %v663_v62 = vadd.f32 1.0, %v1534_v52  ;;  %1555 = vpow2.f32 %v1271_v43  ;;  %v2080_v60 = vadd.f32 %v1905_v23, %v518_v58  ;;  %v1397_v63 = vpop.f32.mrb[10].mxu1 }
 0x1c8   : > { %v1538_v1 = vpop.eup %1537  ;;  %910 = vst.msk [vmem:[%s1983_s9 + $0x20] sm:$0xf] %vm901_vm1, %v2068_v53  ;;  %v2085_v0 = vpack.c.bf16 %v750_v54, %v750_v54  ;;  %v661_v2 = vadd.f32 1.0, %v1536_v57  ;;  %v2088_v3 = vadd.f32 %v1397_v63, %v1905_v23  ;;  %v521_v4 = vpop.f32.mrb[11].mxu1  ;;  %v1276_v8 = vmul.f32 -1.442695, %v2072_v56 }
 0x1c9   : > { %v1540_v5 = vpop.eup %1539  ;;  %913 = vst.msk [vmem:[%s1983_s9 + $0x2c] sm:$0xf] %vm901_vm1, %v2077_v59  ;;  %1557 = vrcp.f32 %v663_v62  ;;  %v664_v6 = vadd.f32 1.0, %v1538_v1  ;;  %v2095_v9 = vadd.f32 %v1905_v23, %v521_v4  ;;  %v1274_v13 = vmul.f32 -1.442695, %v2080_v60 }
 0x1ca   : > { %v1542_v37 = vpop.eup %1541  ;;  %911 = vst.msk [vmem:[%s1983_s9 + $0x24] sm:$0xf] %vm901_vm1, %v2085_v0  ;;  %1559 = vrcp.f32 %v661_v2  ;;  %v662_v12 = vadd.f32 1.0, %v1540_v5  ;;  %v1277_v17 = vmul.f32 -1.442695, %v2088_v3 }
 0x1cb   : > { %v1544_v15 = vpop.eup %1543  ;;  %v755_v42 = vmul.f32 %v1542_v37, %v1962_v10  ;;  %1561 = vrcp.f32 %v664_v6  ;;  %v1275_v24 = vmul.f32 -1.442695, %v2095_v9 }
 0x1cc   : > { %v1546_v19 = vpop.eup %1545  ;;  %v753_v21 = vmul.f32 %v1544_v15, %v1965_v14  ;;  %1563 = vrcp.f32 %v662_v12 }
 0x1cd   : > { %v1548_v26 = vpop.eup %1547  ;;  %v2105_v28 = vpack.c.bf16 %v755_v42, %v755_v42  ;;  %v756_v31 = vmul.f32 %v1546_v19, %v1970_v18  ;;  %1565 = vpow2.f32 %v1276_v8  ;;  %v1400_v32 = vpop.f32.mrb[12].mxu1 }
 0x1ce   : > { %v1550_v34 = vpop.eup %1549  ;;  %v2108_v10 = vpack.c.bf16 %v753_v21, %v753_v21  ;;  %v754_v36 = vmul.f32 %v1548_v26, %v1974_v22  ;;  %1567 = vpow2.f32 %v1274_v13  ;;  %v2112_v25 = vadd.f32 %v1400_v32, %v1905_v23  ;;  %v534_v14 = vpop.f32.mrb[13].mxu1 }
 0x1cf   : > { %v1552_v40 = vpop.eup %1551  ;;  %916 = vst.msk [vmem:[%s1983_s9 + $0x38] sm:$0xf] %vm901_vm1, %v2105_v28  ;;  %v2117_v41 = vpack.c.bf16 %v756_v31, %v756_v31  ;;  %v667_v18 = vadd.f32 1.0, %v1550_v34  ;;  %1569 = vpow2.f32 %v1277_v17  ;;  %v2120_v43 = vadd.f32 %v1905_v23, %v534_v14  ;;  %v1401_v44 = vpop.f32.mrb[14].mxu1 }
 0x1d0   : > { %v1554_v22 = vpop.eup %1553  ;;  %914 = vst.msk [vmem:[%s1983_s9 + $0x30] sm:$0xf] %vm901_vm1, %v2108_v10  ;;  %v2125_v30 = vpack.c.bf16 %v754_v36, %v754_v36  ;;  %v665_v47 = vadd.f32 1.0, %v1552_v40  ;;  %1571 = vpow2.f32 %v1275_v24  ;;  %v537_v50 = vpop.f32.mrb[15].mxu1  ;;  %v1280_v54 = vmul.f32 -1.442695, %v2112_v25 }
 0x1d1   : > { %v1556_v51 = vpop.eup %1555  ;;  %917 = vst.msk [vmem:[%s1983_s9 + $0x3c] sm:$0xf] %vm901_vm1, %v2117_v41  ;;  %1573 = vrcp.f32 %v667_v18  ;;  %v668_v52 = vadd.f32 1.0, %v1554_v22  ;;  %v2132_v58 = vadd.f32 %v1401_v44, %v1905_v23  ;;  %v1278_v62 = vmul.f32 -1.442695, %v2120_v43 }
 0x1d2   : > { %915 = vst.msk [vmem:[%s1983_s9 + $0x34] sm:$0xf] %vm901_vm1, %v2125_v30  ;;  %1575 = vrcp.f32 %v665_v47  ;;  %v666_v57 = vadd.f32 1.0, %v1556_v51  ;;  %v2139_v63 = vadd.f32 %v1905_v23, %v537_v50 }
 0x1d3   : > { %v1558_v1 = vpop.eup %1557  ;;  %1577 = vrcp.f32 %v668_v52  ;;  %v1281_v2 = vmul.f32 -1.442695, %v2132_v58 }
 0x1d4   : > { %v1560_v4 = vpop.eup %1559  ;;  %v759_v5 = vmul.f32 %v1558_v1, %v1994_v46  ;;  %1579 = vrcp.f32 %v666_v57  ;;  %v1279_v6 = vmul.f32 -1.442695, %v2139_v63 }
 0x1d5   : > { %v1562_v8 = vpop.eup %1561  ;;  %v757_v37 = vmul.f32 %v1560_v4, %v2005_v49  ;;  %1581 = vpow2.f32 %v1280_v54 }
 0x1d6   : > { %v1564_v12 = vpop.eup %1563  ;;  %v1337_v13 = vpack.c.bf16 %v759_v5, %v759_v5  ;;  %v760_v23 = vmul.f32 %v1562_v8, %v2012_v55  ;;  %1583 = vpow2.f32 %v1278_v62 }
 0x1d7   : > { %v1566_v15 = vpop.eup %1565  ;;  %v1335_v42 = vpack.c.bf16 %v757_v37, %v757_v37  ;;  %v758_v17 = vmul.f32 %v1564_v12, %v2019_v61  ;;  %1585 = vpow2.f32 %v1281_v2 }
 0x1d8   : > { %v1568_v46 = vpop.eup %1567  ;;  %920 = vst.msk [vmem:[%s1983_s9 + $0x48] sm:$0xf] %vm901_vm1, %v1337_v13  ;;  %v1338_v19 = vpack.c.bf16 %v760_v23, %v760_v23  ;;  %v671_v21 = vadd.f32 1.0, %v1566_v15  ;;  %970 = vrot.lane.b32.xlu1 %v1337_v13, %s1725_s10  ;;  %1587 = vpow2.f32 %v1279_v6 }
 0x1d9   : > { %v1570_v49 = vpop.eup %1569  ;;  %918 = vst.msk [vmem:[%s1983_s9 + $0x40] sm:$0xf] %vm901_vm1, %v1335_v42  ;;  %v2152_v55 = vpack.c.bf16 %v758_v17, %v758_v17  ;;  %v669_v24 = vadd.f32 1.0, %v1568_v46 }
 0x1da   : > { %v1572_v26 = vpop.eup %1571  ;;  %921 = vst.msk [vmem:[%s1983_s9 + $0x4c] sm:$0xf] %vm901_vm1, %v1338_v19  ;;  %1589 = vrcp.f32 %v671_v21  ;;  %v672_v61 = vadd.f32 1.0, %v1570_v49  ;;  %972 = vrot.lane.b32.xlu0 %v1338_v19, %s1725_s10 }
 0x1db   : > { %v1574_v31 = vpop.eup %1573  ;;  %919 = vst.msk [vmem:[%s1983_s9 + $0x44] sm:$0xf] %vm901_vm1, %v2152_v55  ;;  %1591 = vrcp.f32 %v669_v24  ;;  %v670_v32 = vadd.f32 1.0, %v1572_v26 }
 0x1dc   : > { %v1576_v34 = vpop.eup %1575  ;;  %v763_v36 = vmul.f32 %v1574_v31, %v2037_v16  ;;  %1593 = vrcp.f32 %v672_v61  ;;  %934 = vrot.lane.b32.xlu1 %v1988_v38, %s1725_s10 }
 0x1dd   : > { %v1578_v14 = vpop.eup %1577  ;;  %v761_v40 = vmul.f32 %v1576_v34, %v2045_v20  ;;  %1595 = vrcp.f32 %v670_v32 }
 0x1de   : > { %v1580_v18 = vpop.eup %1579  ;;  %v2164_v44 = vpack.c.bf16 %v763_v36, %v763_v36  ;;  %v764_v22 = vmul.f32 %v1578_v14, %v2052_v29 }
 0x1df   : > { %v1582_v47 = vpop.eup %1581  ;;  %v2167_v50 = vpack.c.bf16 %v761_v40, %v761_v40  ;;  %v762_v16 = vmul.f32 %v1580_v18, %v2059_v35 }
 0x1e0   : > { %v1584_v51 = vpop.eup %1583  ;;  %924 = vst.msk [vmem:[%s1983_s9 + $0x58] sm:$0xf] %vm901_vm1, %v2164_v44  ;;  %v1342_v38 = vpack.c.bf16 %v764_v22, %v764_v22  ;;  %966 = vrot.lane.b32.xlu1 %v1335_v42, %s1725_s10  ;;  %v675_v20 = vadd.f32 1.0, %v1582_v47 }
 0x1e1   : > { %v1586_v52 = vpop.eup %1585  ;;  %922 = vst.msk [vmem:[%s1983_s9 + $0x50] sm:$0xf] %vm901_vm1, %v2167_v50  ;;  %v1340_v54 = vpack.c.bf16 %v762_v16, %v762_v16  ;;  %v673_v29 = vadd.f32 1.0, %v1584_v51 }
 0x1e2   : > { %v1588_v57 = vpop.eup %1587  ;;  %925 = vst.msk [vmem:[%s1983_s9 + $0x5c] sm:$0xf] %vm901_vm1, %v1342_v38  ;;  %1597 = vrcp.f32 %v675_v20  ;;  %980 = vrot.lane.b32.xlu0 %v1342_v38, %s1725_s10  ;;  %v676_v35 = vadd.f32 1.0, %v1586_v52 }
 0x1e3   : > { %923 = vst.msk [vmem:[%s1983_s9 + $0x54] sm:$0xf] %vm901_vm1, %v1340_v54  ;;  %1599 = vrcp.f32 %v673_v29  ;;  %v674_v62 = vadd.f32 1.0, %v1588_v57 }
 0x1e4   : > { %v1590_v1 = vpop.eup %1589  ;;  %1601 = vrcp.f32 %v676_v35  ;;  %940 = vrot.lane.b32.xlu1 %v1991_v27, %s1725_s10 }
 0x1e5   : > { %v1592_v2 = vpop.eup %1591  ;;  %v767_v4 = vmul.f32 %v1590_v1, %v2072_v56  ;;  %1603 = vrcp.f32 %v674_v62 }
 0x1e6   : > { %v1594_v5 = vpop.eup %1593  ;;  %v765_v6 = vmul.f32 %v1592_v2, %v2080_v60  ;;  %976 = vrot.lane.b32.xlu0 %v1340_v54, %s1725_s10 }
 0x1e7   : > { %v1596_v8 = vpop.eup %1595  ;;  %v1345_v37 = vpack.c.bf16 %v767_v4, %v767_v4  ;;  %v768_v12 = vmul.f32 %v1594_v5, %v2088_v3 }
 0x1e8   : > { %v1343_v13 = vpack.c.bf16 %v765_v6, %v765_v6  ;;  %v766_v23 = vmul.f32 %v1596_v8, %v2095_v9  ;;  %936 = vrot.lane.b32.xlu1 %v2002_v33, %s1725_s10 }
 0x1e9   : > { %928 = vst.msk [vmem:[%s1983_s9 + $0x68] sm:$0xf] %vm901_vm1, %v1345_v37  ;;  %v1346_v27 = vpack.c.bf16 %v768_v12, %v768_v12 }
 0x1ea   : > { %926 = vst.msk [vmem:[%s1983_s9 + $0x60] sm:$0xf] %vm901_vm1, %v1343_v13  ;;  %v1344_v56 = vpack.c.bf16 %v766_v23, %v766_v23 }
 0x1eb   : > { %929 = vst.msk [vmem:[%s1983_s9 + $0x6c] sm:$0xf] %vm901_vm1, %v1346_v27  ;;  %988 = vrot.lane.b32.xlu0 %v1346_v27, %s1725_s10 }
 0x1ec   : > { %v1598_v60 = vpop.eup %1597  ;;  %927 = vst.msk [vmem:[%s1983_s9 + $0x64] sm:$0xf] %vm901_vm1, %v1344_v56  ;;  %968 = vrot.lane.b32.xlu1 %v2152_v55, %s1725_s10 }
 0x1ed   : > { %v1600_v33 = vpop.eup %1599  ;;  %v771_v3 = vmul.f32 %v1598_v60, %v2112_v25 }
 0x1ee   : > { %v1602_v9 = vpop.eup %1601  ;;  %v769_v15 = vmul.f32 %v1600_v33, %v2120_v43 }
 0x1ef   : > { %v1604_v42 = vpop.eup %1603  ;;  %v1349_v17 = vpack.c.bf16 %v771_v3, %v771_v3  ;;  %v772_v46 = vmul.f32 %v1602_v9, %v2132_v58  ;;  %952 = vrot.lane.b32.xlu0 %v2085_v0, %s1725_s10 }
 0x1f0   : > { %v1347_v19 = vpack.c.bf16 %v769_v15, %v769_v15  ;;  %v770_v21 = vmul.f32 %v1604_v42, %v2139_v63  ;;  %946 = vrot.lane.b32.xlu1 %v2025_v7, %s1725_s10 }
 0x1f1   : > { %932 = vst.msk [vmem:[%s1983_s9 + $0x78] sm:$0xf] %vm901_vm1, %v1349_v17  ;;  %v1350_v25 = vpack.c.bf16 %v772_v46, %v772_v46 }
 0x1f2   : > { %930 = vst.msk [vmem:[%s1983_s9 + $0x70] sm:$0xf] %vm901_vm1, %v1347_v19  ;;  %v1348_v49 = vpack.c.bf16 %v770_v21, %v770_v21 }
 0x1f3   : > { %933 = vst.msk [vmem:[%s1983_s9 + $0x7c] sm:$0xf] %vm901_vm1, %v1350_v25  ;;  %984 = vrot.lane.b32.xlu0 %v1344_v56, %s1725_s10 }
 0x1f4   : > { %931 = vst.msk [vmem:[%s1983_s9 + $0x74] sm:$0xf] %vm901_vm1, %v1348_v49  ;;  %978 = vrot.lane.b32.xlu1 %v2164_v44, %s1725_s10 }
 0x1f7   : > { %992 = vrot.lane.b32.xlu0 %v1348_v49, %s1725_s10 }
 0x1f8   : > { %942 = vrot.lane.b32.xlu1 %v2028_v11, %s1725_s10 }
 0x1fb   : > { %996 = vrot.lane.b32.xlu0 %v1350_v25, %s1725_s10 }
 0x1fc   : > { %974 = vrot.lane.b32.xlu1 %v2167_v50, %s1725_s10 }
 0x200   : > { %948 = vrot.lane.b32.xlu1 %v2034_v39, %s1725_s10 }
 0x204   : > { %944 = vrot.lane.b32.xlu1 %v2042_v45, %s1725_s10 }
 0x208   : > { %954 = vrot.lane.b32.xlu1 %v2065_v48, %s1725_s10 }
 0x20c   : > { %986 = vrot.lane.b32.xlu1 %v1345_v37, %s1725_s10 }
 0x210   : > { %950 = vrot.lane.b32.xlu1 %v2068_v53, %s1725_s10 }
 0x214   : > { %982 = vrot.lane.b32.xlu1 %v1343_v13, %s1725_s10 }
 0x218   : > { %956 = vrot.lane.b32.xlu1 %v2077_v59, %s1725_s10 }
 0x21c   : > { %962 = vrot.lane.b32.xlu1 %v2105_v28, %s1725_s10 }
 0x220   : > { %958 = vrot.lane.b32.xlu1 %v2108_v10, %s1725_s10 }
 0x224   : > { %990 = vrot.lane.b32.xlu1 %v1347_v19, %s1725_s10 }
 0x228   : > { %964 = vrot.lane.b32.xlu1 %v2117_v41, %s1725_s10  ;;  %v939_v7 = vpop.permute.xlu1 %938 }
 0x229   : > { %1032 = vst.msk [vmem:[%s2249_s25 + $0x8] sm:$0xf] %vm901_vm1, %v939_v7 }
 0x22c   : > { %960 = vrot.lane.b32.xlu1 %v2125_v30, %s1725_s10 }
 0x230   : > { %994 = vrot.lane.b32.xlu1 %v1349_v17, %s1725_s10 }
 0x24a   : > { %v971_v11 = vpop.permute.xlu1 %970 }
 0x24b   : > { %1048 = vst.msk [vmem:[%s2249_s25 + $0x48] sm:$0xf] %vm901_vm1, %v971_v11 }
 0x24c   : > { %v973_v39 = vpop.permute.xlu0 %972 }
 0x24d   : > { %1049 = vst.msk [vmem:[%s2249_s25 + $0x4c] sm:$0xf] %vm901_vm1, %v973_v39 }
 0x24e   : > { %v935_v45 = vpop.permute.xlu1 %934 }
 0x24f   : > { %1030 = vst.msk [vmem:[%s2249_s25] sm:$0xf] %vm901_vm1, %v935_v45 }
 0x252   : > { %v967_v48 = vpop.permute.xlu1 %966 }
 0x253   : > { %1046 = vst.msk [vmem:[%s2249_s25 + $0x40] sm:$0xf] %vm901_vm1, %v967_v48 }
 0x254   : > { %v981_v53 = vpop.permute.xlu0 %980 }
 0x255   : > { %1053 = vst.msk [vmem:[%s2249_s25 + $0x5c] sm:$0xf] %vm901_vm1, %v981_v53 }
 0x256   : > { %v941_v59 = vpop.permute.xlu1 %940 }
 0x257   : > { %1033 = vst.msk [vmem:[%s2249_s25 + $0xc] sm:$0xf] %vm901_vm1, %v941_v59 }
 0x258   : > { %v977_v0 = vpop.permute.xlu0 %976 }
 0x259   : > { %1051 = vst.msk [vmem:[%s2249_s25 + $0x54] sm:$0xf] %vm901_vm1, %v977_v0 }
 0x25a   : > { %v937_v28 = vpop.permute.xlu1 %936 }
 0x25b   : > { %1031 = vst.msk [vmem:[%s2249_s25 + $0x4] sm:$0xf] %vm901_vm1, %v937_v28 }
 0x25d   : > { %v989_v10 = vpop.permute.xlu0 %988 }
 0x25e   : > { %1057 = vst.msk [vmem:[%s2249_s25 + $0x6c] sm:$0xf] %vm901_vm1, %v989_v10  ;;  %v969_v41 = vpop.permute.xlu1 %968 }
 0x25f   : > { %1047 = vst.msk [vmem:[%s2249_s25 + $0x44] sm:$0xf] %vm901_vm1, %v969_v41 }
 0x261   : > { %v953_v43 = vpop.permute.xlu0 %952 }
 0x262   : > { %1039 = vst.msk [vmem:[%s2249_s25 + $0x24] sm:$0xf] %vm901_vm1, %v953_v43  ;;  %v947_v30 = vpop.permute.xlu1 %946 }
 0x263   : > { %1036 = vst.msk [vmem:[%s2249_s25 + $0x18] sm:$0xf] %vm901_vm1, %v947_v30 }
 0x265   : > { %v985_v58 = vpop.permute.xlu0 %984 }
 0x266   : > { %1055 = vst.msk [vmem:[%s2249_s25 + $0x64] sm:$0xf] %vm901_vm1, %v985_v58  ;;  %v979_v63 = vpop.permute.xlu1 %978 }
 0x267   : > { %1052 = vst.msk [vmem:[%s2249_s25 + $0x58] sm:$0xf] %vm901_vm1, %v979_v63 }
 0x269   : > { %v993_v55 = vpop.permute.xlu0 %992 }
 0x26a   : > { %v943_v24 = vpop.permute.xlu1 %942  ;;  %1059 = vst.msk [vmem:[%s2249_s25 + $0x74] sm:$0xf] %vm901_vm1, %v993_v55 }
 0x26b   : > { %1034 = vst.msk [vmem:[%s2249_s25 + $0x10] sm:$0xf] %vm901_vm1, %v943_v24 }
 0x26d   : > { %v997_v26 = vpop.permute.xlu0 %996 }
 0x26e   : > { %v975_v61 = vpop.permute.xlu1 %974  ;;  %1061 = vst.msk [vmem:[%s2249_s25 + $0x7c] sm:$0xf] %vm901_vm1, %v997_v26 }
 0x26f   : > { %1050 = vst.msk [vmem:[%s2249_s25 + $0x50] sm:$0xf] %vm901_vm1, %v975_v61 }
 0x272   : > { %v949_v31 = vpop.permute.xlu1 %948 }
 0x273   : > { %1037 = vst.msk [vmem:[%s2249_s25 + $0x1c] sm:$0xf] %vm901_vm1, %v949_v31 }
 0x276   : > { %v945_v32 = vpop.permute.xlu1 %944 }
 0x277   : > { %1035 = vst.msk [vmem:[%s2249_s25 + $0x14] sm:$0xf] %vm901_vm1, %v945_v32 }
 0x27a   : > { %v955_v34 = vpop.permute.xlu1 %954 }
 0x27b   : > { %1040 = vst.msk [vmem:[%s2249_s25 + $0x28] sm:$0xf] %vm901_vm1, %v955_v34 }
 0x27e   : > { %v987_v36 = vpop.permute.xlu1 %986 }
 0x27f   : > { %1056 = vst.msk [vmem:[%s2249_s25 + $0x68] sm:$0xf] %vm901_vm1, %v987_v36 }
 0x282   : > { %v951_v14 = vpop.permute.xlu1 %950 }
 0x283   : > { %1038 = vst.msk [vmem:[%s2249_s25 + $0x20] sm:$0xf] %vm901_vm1, %v951_v14 }
 0x286   : > { %v983_v40 = vpop.permute.xlu1 %982 }
 0x287   : > { %1054 = vst.msk [vmem:[%s2249_s25 + $0x60] sm:$0xf] %vm901_vm1, %v983_v40 }
 0x28a   : > { %v957_v18 = vpop.permute.xlu1 %956 }
 0x28b   : > { %1041 = vst.msk [vmem:[%s2249_s25 + $0x2c] sm:$0xf] %vm901_vm1, %v957_v18 }
 0x28e   : > { %v963_v44 = vpop.permute.xlu1 %962 }
 0x28f   : > { %1044 = vst.msk [vmem:[%s2249_s25 + $0x38] sm:$0xf] %vm901_vm1, %v963_v44 }
 0x292   : > { %v959_v22 = vpop.permute.xlu1 %958 }
 0x293   : > { %1042 = vst.msk [vmem:[%s2249_s25 + $0x30] sm:$0xf] %vm901_vm1, %v959_v22 }
 0x296   : > { %v991_v47 = vpop.permute.xlu1 %990 }
 0x297   : > { %1058 = vst.msk [vmem:[%s2249_s25 + $0x70] sm:$0xf] %vm901_vm1, %v991_v47 }
 0x29a   : > { %v965_v50 = vpop.permute.xlu1 %964 }
 0x29b   : > { %1045 = vst.msk [vmem:[%s2249_s25 + $0x3c] sm:$0xf] %vm901_vm1, %v965_v50 }
 0x29e   : > { %v961_v16 = vpop.permute.xlu1 %960 }
 0x29f   : > { %1043 = vst.msk [vmem:[%s2249_s25 + $0x34] sm:$0xf] %vm901_vm1, %v961_v16 }
 0x2a2   : > { %v995_v51 = vpop.permute.xlu1 %994 }
 0x2a3   : > { %1060 = vst.msk [vmem:[%s2249_s25 + $0x78] sm:$0xf] %vm901_vm1, %v995_v51 }
 0x2a4 PF: > { %s19_s20 = sadd.s32 1, %s1717_s20   ;;  %s2355_s15 = smov %s1701_s16 }
 0x2a5   : > { %p16_p1 = scmp.ge.s32.totalorder %s19_s20, 4   ;;  %s2356_s16 = smov %s1705_s17 }
 0x2a6   : > { %s2357_s17 = smov %s1834_s5  ;;  %s2358_s18 = smov %s1713_s19 }
 0x2a7   : > { %s2359_s19 = smov %s2361_s28  ;;  %18 = sbr.rel (!%p16_p1) target bundleno = 5 (0x5), region = 88 }
 0x2ae   :  { %1117 = vsyncpa [#allocation3], 1 }
 0x2af   :  { %1119 = vsyncpa [#allocation3 + $0x1], 1 }
 0x2b0   :  { %1120 = vsyncpa [#allocation5], 1 }

</bundles_post_ra>
